<compile_context>
chip_gen: v7x
topology: tpu7x:2x2x1
jax: 0.10.0
libtpu: 0.0.40
codegen_flags: <defaults>
</compile_context>

<pallas_src>
import math

import jax
import jax.numpy as jnp
from jax.experimental import pallas as pl
from jax.experimental.pallas import tpu as pltpu


def _round_up(x, m):
    return (x + m - 1) // m * m


def _device_kind():
    try:
        return jax.devices()[0].device_kind.lower()
    except Exception:
        return ""


def _num_tensorcores():
    """TensorCores per JAX device (used to decide whether >=2 grid steps pay off)."""
    kind = _device_kind()
    # Single-TC-per-device chips: v2/v3 (per-core devices), v5e, v6e.
    for tag in ("v2", "v3", "v5e", "v5 lite", "v5lite",
                "v6e", "v6 lite", "v6lite"):
        if tag in kind:
            return 1
    # v4 / v5p (megacore) and v7x expose 2 TensorCores per device.
    return 2


def _mxu_align():
    """Row-tile alignment: 128 on v5e-class chips (128-wide MXU), 256 on v6e/v7x."""
    kind = _device_kind()
    for tag in ("v2", "v3", "v5e", "v5 lite", "v5lite"):
        if tag in kind:
            return 128
    return 256


def _vmem_limit_bytes():
    """Scoped-VMEM budget: 3/4 of physical, capped at 96 MiB."""
    try:
        phys = pltpu.get_tpu_info().vmem_capacity_bytes
    except Exception:
        # Fallback keyed off the device kind (v7x: 64 MiB, others: 128 MiB)
        # instead of silently assuming the smallest chip.
        phys = (64 << 20) if "v7" in _device_kind() else (128 << 20)
    return int(min(phys * 3 // 4, 96 * 1024 * 1024))


def _choose_row_tile(n_rows, per_row_bytes, resident_bytes, vmem_limit,
                     num_cores, align):
    """Largest aligned row tile whose VMEM working set fits the scoped budget."""
    budget = max(vmem_limit - (4 << 20), 8 << 20)      # headroom for internal scratch
    avail = max(budget - resident_bytes, 1 << 20)
    max_tile = max(align, (avail // max(per_row_bytes, 1)) // align * align)
    max_tile = min(max_tile, 2048)                     # HBM roofline plateaus ~1-2K rows

    if n_rows <= 512 or (num_cores == 1 and n_rows <= max_tile):
        # Single grid step whose blocks span the full arrays: no (8,128)
        # divisibility constraints, no over-run rows, no extra step overhead.
        return n_rows
    if num_cores >= 2:
        # Keep >= num_cores grid steps so the "parallel" axis shards across TCs.
        per_core = -(-n_rows // num_cores)
        if per_core <= max_tile:
            return max(align, min(max_tile, _round_up(per_core, align)))
    return max_tile


def _disc_kernel(x_ref, s_ref, w_ref, o_ref):
    # h = summary @ W on the MXU: streamed operand cast to bf16 in-register
    # (inputs stay in their native dtype in HBM), f32 accumulation.
    h = jnp.dot(s_ref[...].astype(jnp.bfloat16), w_ref[...],
                preferred_element_type=jnp.float32)
    # out_i = sum_j x_ij * h_ij : f32 elementwise (VPU) + lane reduction (XLU).
    prod = x_ref[...].astype(jnp.float32) * h
    # Lane-dense store: one (1, row_tile) slab per grid step.
    # TODO(synk): for tiny H profile a (row_tile, 1) keepdims store against
    # this XLU sublane->lane relayout (low priority).
    o_ref[...] = jnp.sum(prod, axis=1)[None, :]


def _disc_bcast_kernel(x_ref, v_ref, o_ref):
    # Broadcast-summary fast path: v = summary_row @ W precomputed in the
    # wrapper; the kernel is a pure streaming row-wise dot of x with v.
    prod = x_ref[...].astype(jnp.float32) * v_ref[...].astype(jnp.float32)
    o_ref[...] = jnp.sum(prod, axis=1)[None, :]


def discriminator_forward(x, summary, weight, *, row_tile=None):
    """x: (N, H), summary: (N, H) or (1, H) or (H,), weight: (H, H) -> (N,) f32."""
    x = jnp.asarray(x)
    summary = jnp.asarray(summary)
    weight = jnp.asarray(weight)

    N, H = x.shape
    assert weight.shape == (H, H)
    if summary.ndim == 1:
        summary = summary[None, :]

    num_cores = _num_tensorcores()
    align = _mxu_align()
    vmem_limit = _vmem_limit_bytes()
    compiler_params = pltpu.CompilerParams(
        dimension_semantics=("parallel",),
        vmem_limit_bytes=vmem_limit,
    )

    # ---- Broadcast-summary fast path (single graph summary for all nodes) ----
    if summary.shape[0] == 1 and N > 1:
        # Collapse O(N*H^2) MXU work to an O(H^2) wrapper matvec; the kernel
        # streams only x (no resident weight in VMEM).
        v = summary.astype(jnp.float32) @ weight.astype(jnp.float32)   # (1, H)
        if row_tile is None:
            per_row = 2 * x.dtype.itemsize * H + 4 * H + 2 * 4
            row_tile = _choose_row_tile(N, per_row, 4 * H, vmem_limit,
                                        num_cores, align)
        num_tiles = pl.cdiv(N, row_tile)
        cost = pl.CostEstimate(
            flops=int(2 * N * H),
            transcendentals=0,
            bytes_accessed=int(x.size * x.dtype.itemsize + 4 * H + 4 * N),
        )
        out = pl.pallas_call(
            _disc_bcast_kernel,
            out_shape=jax.ShapeDtypeStruct((1, N), jnp.float32),
            grid_spec=pltpu.PrefetchScalarGridSpec(
                num_scalar_prefetch=0,
                grid=(num_tiles,),
                in_specs=[
                    pl.BlockSpec((row_tile, H), lambda i: (i, 0)),   # x tile
                    pl.BlockSpec((1, H), lambda i: (0, 0),
                                 pipeline_mode=pl.Buffered(1)),      # resident v
                ],
                out_specs=pl.BlockSpec((1, row_tile), lambda i: (0, i)),
            ),
            compiler_params=compiler_params,
            cost_estimate=cost,
        )(x, v)
        return out[0]

    # ---- General per-node-summary path ---------------------------------------
    assert summary.shape == (N, H)

    # Weight is tiny (H, H): cast once to bf16; kept resident & single-buffered.
    w_bf16 = weight.astype(jnp.bfloat16)

    if row_tile is None:
        # Per-row VMEM: double-buffered x + summary tiles (native dtype)
        # + f32 intermediates (h and x*h) + double-buffered f32 output lane.
        per_row = (2 * x.dtype.itemsize * H
                   + 2 * summary.dtype.itemsize * H
                   + 2 * 4 * H
                   + 2 * 4)
        resident = 2 * H * H           # bf16 weight, Buffered(1): single copy
        row_tile = _choose_row_tile(N, per_row, resident, vmem_limit,
                                    num_cores, align)
    num_tiles = pl.cdiv(N, row_tile)

    cost = pl.CostEstimate(
        flops=int(2 * N * H * H + 2 * N * H),
        transcendentals=0,
        bytes_accessed=int(x.size * x.dtype.itemsize
                           + summary.size * summary.dtype.itemsize
                           + 2 * H * H + 4 * N),
    )

    out = pl.pallas_call(
        _disc_kernel,
        out_shape=jax.ShapeDtypeStruct((1, N), jnp.float32),
        grid_spec=pltpu.PrefetchScalarGridSpec(
            num_scalar_prefetch=0,
            grid=(num_tiles,),
            in_specs=[
                pl.BlockSpec((row_tile, H), lambda i: (i, 0)),   # x tile (native dtype)
                pl.BlockSpec((row_tile, H), lambda i: (i, 0)),   # summary tile
                pl.BlockSpec((H, H), lambda i: (0, 0),
                             pipeline_mode=pl.Buffered(1)),      # resident bf16 weight
            ],
            out_specs=pl.BlockSpec((1, row_tile), lambda i: (0, i)),
        ),
        compiler_params=compiler_params,
        cost_estimate=cost,
    )(x, summary, w_bf16)
    return out[0]


def init_discriminator_weight(key, hidden_dim, dtype=jnp.float32):
    # Matches torch_geometric `uniform(size, weight)`:
    #   bound = 1 / sqrt(size); weight ~ U(-bound, bound)
    bound = 1.0 / math.sqrt(hidden_dim)
    return jax.random.uniform(
        key, (hidden_dim, hidden_dim), minval=-bound, maxval=bound, dtype=dtype
    )


def _reference_f32(x, summary, weight):
    return jnp.sum(x * (summary @ weight), axis=1)


def _reference_mixed(x, summary, weight):
    # Kernel numerics: summary & weight in bf16 (MXU), x and the reduce in f32.
    sb = summary.astype(jnp.bfloat16).astype(jnp.float32)
    wb = weight.astype(jnp.bfloat16).astype(jnp.float32)
    return jnp.sum(x * (sb @ wb), axis=1)


if __name__ == "__main__":
    key = jax.random.PRNGKey(0)
    ks = jax.random.split(key, 7)

    # --- Test 1: small single-tile case (8 nodes, hidden_dim=32) ------------
    N, H = 8, 32
    weight = init_discriminator_weight(ks[0], H)
    x = jax.random.normal(ks[1], (N, H), dtype=jnp.float32)
    summary = jax.random.normal(ks[2], (N, H), dtype=jnp.float32)

    out = jax.block_until_ready(discriminator_forward(x, summary, weight))
    assert out.shape == (N,)
    ref_mixed = _reference_mixed(x, summary, weight)
    ref_f32 = _reference_f32(x, summary, weight)
    assert jnp.allclose(out, ref_mixed, atol=1e-2, rtol=1e-2), (out, ref_mixed)
    assert jnp.allclose(out, ref_f32, atol=1e-1, rtol=1e-1), (out, ref_f32)

    # --- Test 2: ragged N, multi-tile grid with grid over-run (no padding) --
    N2, H2 = 300, 48
    weight2 = init_discriminator_weight(ks[3], H2)
    x2 = jax.random.normal(ks[4], (N2, H2), dtype=jnp.float32)
    summary2 = jax.random.normal(ks[5], (N2, H2), dtype=jnp.float32)

    out2 = jax.block_until_ready(
        discriminator_forward(x2, summary2, weight2, row_tile=128)
    )
    assert out2.shape == (N2,)
    ref2_mixed = _reference_mixed(x2, summary2, weight2)
    ref2_f32 = _reference_f32(x2, summary2, weight2)
    assert jnp.allclose(out2, ref2_mixed, atol=1e-2, rtol=1e-2), (out2, ref2_mixed)
    assert jnp.allclose(out2, ref2_f32, atol=2e-1, rtol=1e-1), (out2, ref2_f32)

    # --- Test 3: broadcast summary (usual DGI/DRGCL case) fast path ---------
    summary3 = jax.random.normal(ks[6], (1, H2), dtype=jnp.float32)
    out3 = jax.block_until_ready(discriminator_forward(x2, summary3, weight2))
    assert out3.shape == (N2,)
    ref3 = jnp.sum(x2 * (summary3 @ weight2), axis=1)
    assert jnp.allclose(out3, ref3, atol=1e-2, rtol=1e-2), (out3, ref3)

    print("KERNEL_OK")
</pallas_src>

<mosaic_0001>
module attributes {stable_mosaic.version = 11 : i64} {
  func.func @_disc_kernel(%arg0: i32, %arg1: memref<8x32xf32, #tpu.memory_space<vmem>>, %arg2: memref<8x32xf32, #tpu.memory_space<vmem>>, %arg3: memref<32x32xbf16, #tpu.memory_space<vmem>>, %arg4: memref<1x8xf32, #tpu.memory_space<vmem>>) attributes {dimension_semantics = [#tpu.dimension_semantics<parallel>], iteration_bounds = array<i64: 1>, scalar_prefetch = 0 : i64, scratch_operands = 0 : i64, tpu.core_type = #tpu.core_type<tc>, window_params = [{transform_indices = @transform_0, window_bounds = array<i64: 8, 32>}, {transform_indices = @transform_1, window_bounds = array<i64: 8, 32>}, {pipeline_mode = #tpu.pipeline_mode<synchronous>, transform_indices = @transform_2, window_bounds = array<i64: 32, 32>}, {transform_indices = @transform_3, window_bounds = array<i64: 1, 8>}]} {
    %c0 = arith.constant 0 : index
    %c0_0 = arith.constant 0 : index
    %0 = vector.load %arg2[%c0, %c0_0] : memref<8x32xf32, #tpu.memory_space<vmem>>, vector<8x32xf32>
    %1 = arith.truncf %0 : vector<8x32xf32> to vector<8x32xbf16>
    %c0_1 = arith.constant 0 : index
    %c0_2 = arith.constant 0 : index
    %2 = vector.load %arg3[%c0_1, %c0_2] : memref<32x32xbf16, #tpu.memory_space<vmem>>, vector<32x32xbf16>
    %cst = arith.constant dense<0.000000e+00> : vector<8x32xf32>
    %3 = tpu.matmul %1, %2, %cst {dimension_numbers = #tpu.dot_dimension_numbers<[1], [0], [0], [1], [0, 0, 1, 1], [], []>} : vector<8x32xbf16>, vector<32x32xbf16>, vector<8x32xf32> -> vector<8x32xf32>
    %c0_3 = arith.constant 0 : index
    %c0_4 = arith.constant 0 : index
    %4 = vector.load %arg1[%c0_3, %c0_4] : memref<8x32xf32, #tpu.memory_space<vmem>>, vector<8x32xf32>
    %5 = arith.mulf %4, %3 : vector<8x32xf32>
    %cst_5 = arith.constant dense<0.000000e+00> : vector<8xf32>
    %6 = vector.multi_reduction <add>, %5, %cst_5 [1] : vector<8x32xf32> to vector<8xf32>
    %7 = vector.shape_cast %6 : vector<8xf32> to vector<1x8xf32>
    %c0_6 = arith.constant 0 : index
    %c0_7 = arith.constant 0 : index
    %8 = vector.load %arg4[%c0_6, %c0_7] : memref<1x8xf32, #tpu.memory_space<vmem>>, vector<1x8xf32>
    tpu.vector_store %arg4[%c0_6, %c0_7], %7 {strides = array<i32>} : memref<1x8xf32, #tpu.memory_space<vmem>>, vector<1x8xf32>,
    return
  }
  func.func @transform_0(%arg0: i32) -> (i32, i32) {
    %c0_i32 = arith.constant 0 : i32
    %c0_i32_0 = arith.constant 0 : i32
    return %arg0, %c0_i32 : i32, i32
  }
  func.func @transform_1(%arg0: i32) -> (i32, i32) {
    %c0_i32 = arith.constant 0 : i32
    %c0_i32_0 = arith.constant 0 : i32
    return %arg0, %c0_i32 : i32, i32
  }
  func.func @transform_2(%arg0: i32) -> (i32, i32) {
    %c0_i32 = arith.constant 0 : i32
    %c0_i32_0 = arith.constant 0 : i32
    %c0_i32_1 = arith.constant 0 : i32
    return %c0_i32, %c0_i32_0 : i32, i32
  }
  func.func @transform_3(%arg0: i32) -> (i32, i32) {
    %c0_i32 = arith.constant 0 : i32
    %c0_i32_0 = arith.constant 0 : i32
    return %c0_i32, %arg0 : i32, i32
  }
}

</mosaic_0001>

<bundles_post_ra>
// kernel: tpu_custom_call.1
= control target key start
LH: loop header
LB: loop body
LE: loop exit
PB: predicated region body
PF: predicated region fallthrough
CT: control target
= control target key end

     0   :  { %8 = vsyncpa [#allocation3], 0  ;;  %s340_s0 = inlined_call_operand.hbm [shape: f32[8,32], index: 0, kind: input, shape index: {}]   ;;  %s341_s1 = inlined_call_operand.hbm [shape: f32[8,32], index: 1, kind: input, shape index: {}]   ;;  %s342_s2 = inlined_call_operand.hbm [shape: bf16[32,32], index: 2, kind: input, shape index: {}]   ;;  %s343_s3 = inlined_call_operand.hbm [shape: f32[1,8], index: 3, kind: output, shape index: {}]  }
   0x1   :  { %9 = vsyncpa [#allocation6], 0 }
   0x2   :  { %10 = vsyncpa [#allocation4], 0  ;;  %s264_s12 = smov [#allocation5]   ;;  %s265_s14 = smov [#allocation2]  }
   0x3   :  { %s27_s13 = sshll.u32 %s264_s12, 4  ;;  %s17_s15 = sshll.u32 %s265_s14, 4  ;;  %s28_s13 = int_to_ptr.vmem [resolvable:$true] %s27_s13  ;;  %s18_s15 = int_to_ptr.vmem [resolvable:$true] %s17_s15 }
   0x4   :  { %s170_s18 = scalar_lea.hbm %s341_s1, 128 }
   0x5   :  { %p171_p0 = scmp.ne.s32.totalorder %s341_s1, %s170_s18  ;;  %p174_p1 = scmp.lt.u32.totalorder %s170_s18, %s341_s1 }
   0x7   :  { %p176_p2 = pnand %p174_p1, %p171_p0 }
   0x9   :  { %179 = shalt.err (!%p176_p2)
}
   0xa   :  { %s180_s23 = scalar_lea.vmem %s28_s13, 128  ;;  %p185_p4 = scmp.lt.s32.totalorder %s28_s13, %s28_s13 }
   0xb   :  { %p181_p3 = scmp.ne.s32.totalorder %s28_s13, %s180_s23  ;;  %p186_p5 = scmp.lt.s32.totalorder %s180_s23, %s180_s23 }
   0xd   :  { %p187_p6 = por %p186_p5, %p185_p4 }
   0xf   :  { %p188_p7 = pnand %p187_p6, %p181_p3 }
  0x11   :  { %191 = shalt.err (!%p188_p7)
}
  0x12   :  { %30 = dma.hbm_to_vmem [thread:$0]  %s341_s1, 128, %s28_s13, [#allocation6]  }
  0x13   :  { %s192_s28 = scalar_lea.hbm %s340_s0, 128 }
  0x14   :  { %p193_p8 = scmp.ne.s32.totalorder %s340_s0, %s192_s28  ;;  %p196_p9 = scmp.lt.u32.totalorder %s192_s28, %s340_s0 }
  0x16   :  { %p198_p10 = pnand %p196_p9, %p193_p8 }
  0x18   :  { %201 = shalt.err (!%p198_p10)
}
  0x19   :  { %s202_s6 = scalar_lea.vmem %s18_s15, 128  ;;  %p207_p12 = scmp.lt.s32.totalorder %s18_s15, %s18_s15 }
  0x1a   :  { %p203_p11 = scmp.ne.s32.totalorder %s18_s15, %s202_s6  ;;  %p208_p13 = scmp.lt.s32.totalorder %s202_s6, %s202_s6 }
  0x1c   :  { %p209_p0 = por %p208_p13, %p207_p12 }
  0x1e   :  { %p210_p1 = pnand %p209_p0, %p203_p11 }
  0x20   :  { %213 = shalt.err (!%p210_p1)
}
  0x21   :  { %20 = dma.hbm_to_vmem [thread:$0]  %s340_s0, 128, %s18_s15, [#allocation3]  }
  0x22   :  { %s266_s8 = smov [#allocation7]   ;;  %s214_s12 = scalar_lea.hbm %s342_s2, 256 }
  0x23   :  { %s36_s9 = sshll.u32 %s266_s8, 4  ;;  %p215_p2 = scmp.ne.s32.totalorder %s342_s2, %s214_s12  ;;  %s37_s9 = int_to_ptr.vmem [resolvable:$true] %s36_s9 }
  0x24   :  { %p218_p3 = scmp.lt.u32.totalorder %s214_s12, %s342_s2 }
  0x26   :  { %p220_p4 = pnand %p218_p3, %p215_p2 }
  0x28   :  { %223 = shalt.err (!%p220_p4)
}
  0x29   :  { %s224_s18 = scalar_lea.vmem %s37_s9, 256  ;;  %p229_p6 = scmp.lt.s32.totalorder %s37_s9, %s37_s9 }
  0x2a   :  { %p225_p5 = scmp.ne.s32.totalorder %s37_s9, %s224_s18  ;;  %p230_p7 = scmp.lt.s32.totalorder %s224_s18, %s224_s18 }
  0x2c   :  { %p231_p8 = por %p230_p7, %p229_p6 }
  0x2e   :  { %p232_p9 = pnand %p231_p8, %p225_p5 }
  0x30   :  { %235 = shalt.err (!%p232_p9)
}
  0x31   :  { %s267_s0 = smov 64   ;;  %s268_s15 = smov 4  }
  0x32   :  { %42 = dma.hbm_to_vmem [thread:$0]  %s342_s2, 256, %s37_s9, [#allocation6], %s267_s0, %s267_s0, %s268_s15  }
  0x33   :  { %258 = dma.done.wait [#allocation3], 128  }
  0x34   :  { %259 = vsyncadd [#allocation3], 4294967168 }
  0x35   :  { %260 = dma.done.wait [#allocation6], 384  }
  0x36   :  { %261 = vsyncadd [#allocation6], 4294966912  ;;  %v269_v0 = vmov 0.0   ;;  %vm270_vm0 = vmmov 0   ;;  %v168_v1 = vld [vmem:[#allocation7] sm:$0xff]   ;;  %v169_v2 = vld [vmem:[#allocation7 + $0x8] sm:$0xff]   ;;  %v121_v12 = vlaneseq }
  0x37   :  { %152 = vmatprep.subr.bf16.mxu0 %v269_v0  ;;  %156 = vmatprep.mubr.msk.bf16.mxu0 %vm270_vm0, %v269_v0  ;;  %v53_v3 = vld [vmem:[#allocation5] sm:$0xff]  ;;  %vm71_vm1 = vcmask 261120   ;;  %v115_v5 = vld [vmem:[#allocation2] sm:$0xff]  ;;  %s271_s2 = smov [#allocation8]   ;;  %vm128_vm2 = vcmask 57344  }
  0x38   :  { %153 = vmatpush3.bf16.msra.mxu0 %v168_v1  ;;  %v54_v4 = vpack.c.bf16 %v53_v3, %v53_v3  ;;  %v122_v13 = vand.u32 127, %v121_v12  ;;  %v124_v14 = vshrl.u32 %v121_v12, 7  ;;  %s136_s21 = sshll.u32 %s271_s2, 4  ;;  %s137_s21 = int_to_ptr.vmem [resolvable:$true] %s136_s21 }
  0x39   :  { %154 = vmatprep.subr.bf16.mxu0 %v269_v0  ;;  %s236_s22 = scalar_lea.vmem %s137_s21, 16  ;;  %s240_s23 = scalar_lea.vmem %s137_s21, 32 }
  0x3a   :  { %v125_v15 = vsub.s32 %v122_v13, %v124_v14  ;;  %p237_p10 = scmp.ne.s32.totalorder %s137_s21, %s236_s22  ;;  %p241_p11 = scmp.lt.s32.totalorder %s137_s21, %s137_s21 }
  0x3b   :  { %p242_p12 = scmp.lt.s32.totalorder %s240_s23, %s236_s22 }
  0x3c   :  { %155 = vmatpush3.bf16.msra.mxu0 %v169_v2 }
  0x3d   :  { %p243_p13 = por %p242_p12, %p241_p11 }
  0x3f   :  { %157 = vmatmul.mubr.msk.bf16.vlgmr.msra.gmra.mrb[0].mxu0 %vm71_vm1, %v54_v4  ;;  %p244_p0 = pnand %p243_p13, %p237_p10 }
 0x112   :  { %v109_v6 = vpop.f32.mrb[0].mxu0 }
 0x113   :  { %v116_v7 = vmul.f32 %v115_v5, %v109_v6  ;;  %v158_v8 = vpop.f32.mrb[1].mxu0 }
 0x114   :  { %v112_v9 = vpop.f32.mrb[2].mxu0 }
 0x115   :  { %v159_v10 = vpop.f32.mrb[3].mxu0  ;;  %v117_v11 = vsel %vm71_vm1, %v116_v7, 0.0 }
 0x116   :  { %118 = vadd.xlane.f32.xlu0 %v117_v11 }
 0x1a3   :  { %v119_v16 = vpop.xlane.xlu0 %118 }
 0x1a4   :  { %v126_v17 = vrot.slane %v119_v16, %v125_v15 }
 0x1a6   :  { %129 = vst.msk [vmem:[#allocation8] sm:$0x1] %vm128_vm2, %v126_v17 }
 0x1a7   :  { %247 = shalt.err (!%p244_p0)
}
 0x1a8   :  { %s248_s26 = scalar_lea.hbm %s343_s3, 16 }
 0x1a9   :  { %p249_p1 = scmp.ne.s32.totalorder %s343_s3, %s248_s26  ;;  %p252_p2 = scmp.lt.u32.totalorder %s248_s26, %s343_s3 }
 0x1ab   :  { %p254_p3 = pnand %p252_p2, %p249_p1 }
 0x1ad   :  { %257 = shalt.err (!%p254_p3)
}
 0x1ae   :  { %139 = dma.vmem_to_hbm [thread:$0]  %s137_s21, 16, %s343_s3, [#allocation4]  }
 0x1af   :  { %262 = dma.done.wait [#allocation4], 16  }
 0x1b0   :  { %263 = vsyncadd [#allocation4], 4294967280 }
 0x1b1   :  { %143 = vsyncpa [#allocation3], 1 }
 0x1b2   :  { %144 = vsyncpa [#allocation6], 1 }
 0x1b3   :  { %145 = vsyncpa [#allocation4], 1 }

</bundles_post_ra>
